<compile_context>
chip_gen: v5e
topology: v5e:2x2
jax: 0.10.0
libtpu: 0.0.40
codegen_flags: <defaults>
</compile_context>

<pallas_src>
import functools

import jax
import jax.numpy as jnp
import numpy as np
from jax.experimental import pallas as pl
from jax.experimental.pallas import tpu as pltpu

NEG_INF = -1e30        # finite "-inf": keeps max/exp well defined on fully masked rows
LEAKY_SLOPE = 0.01     # torch.nn.LeakyReLU default


def _round_up(x, m):
    return ((x + m - 1) // m) * m


# ---------------------------------------------------------------------------
# Stage 1: fused projection GEMM (h, self-scores and neighbor-scores in one matmul)
# ---------------------------------------------------------------------------
def _proj_kernel(feat_ref, w_ref, b_ref, h_ref, sc_ref, *, hd):
    """feat (tile, D_in) @ w_ext (D_in, H*D_out + 2H) + b_ext, split into h / scores."""
    y = jnp.dot(feat_ref[...], w_ref[...],
                preferred_element_type=jnp.float32) + b_ref[...]
    h_ref[...] = y[:, :hd].astype(h_ref.dtype)    # packed per-head h      (tile, H*D_out)
    sc_ref[...] = y[:, hd:]                       # [self | nbr] scores    (tile, 2H) f32


# ---------------------------------------------------------------------------
# Stage 2: block-sparse flash-style attention over the adjacency mask
# ---------------------------------------------------------------------------
def _gat_attn_kernel(tmap_ref, cnt_ref,            # scalar-prefetch (SMEM)
                     h_ref, snbr_ref, sself_ref, mask_ref,   # inputs
                     out_ref,                      # output
                     m_sc, l_sc, acc_sc,           # VMEM scratch
                     *, num_heads, d_out):
    """One (N-tile, active n'-tile) grid step.

    h_ref     : (tile_np, H*D_out)  packed neighbor projections (mm dtype)
    snbr_ref  : (H, tile_np)        neighbor attention scores, pre-transposed, f32
    sself_ref : (tile_n, H)         self attention scores (+ a_bias folded), f32
    mask_ref  : (tile_n, tile_np)   int8 adjacency mask
    out_ref   : (tile_n, H*D_out)   packed per-head outputs (written once per N tile)
    m_sc/l_sc : (tile_n, H)         lane-dense online-softmax running max / denominator
    acc_sc    : (tile_n, H*D_out)   lane-dense online-softmax running numerator
    """
    i = pl.program_id(0)
    jj = pl.program_id(1)
    nj = pl.num_programs(1)

    @pl.when(jj == 0)
    def _init():
        m_sc[...] = jnp.full(m_sc.shape, NEG_INF, jnp.float32)
        l_sc[...] = jnp.zeros(l_sc.shape, jnp.float32)
        acc_sc[...] = jnp.zeros(acc_sc.shape, jnp.float32)

    # Skip padded entries of the per-N-tile active-tile list (block sparsity).
    @pl.when(jj < cnt_ref[i])
    def _compute():
        h = h_ref[...]                              # (tile_np, H*D_out)
        s_nbr_t = snbr_ref[...]                     # (H, tile_np) f32
        s_self = sself_ref[...]                     # (tile_n, H)  f32
        nbr_mask = mask_ref[...] != 0               # (tile_n, tile_np) bool

        m_prev = m_sc[...]                          # (tile_n, H)
        l_prev = l_sc[...]
        acc_prev = acc_sc[...]                      # (tile_n, H*D_out)

        m_cols, l_cols, acc_cols = [], [], []
        for k in range(num_heads):                  # static unroll, H is small
            sl = slice(k * d_out, (k + 1) * d_out)

            # e_ij = leakyrelu(s_self_i + s_nbr_j) (a_bias already folded into s_self)
            e = s_self[:, k:k + 1] + s_nbr_t[k:k + 1, :]            # (tile_n, tile_np)
            e = jnp.where(e >= 0, e, LEAKY_SLOPE * e)
            e = jnp.where(nbr_mask, e, NEG_INF)

            # flash-style online softmax across the active n' tiles of this row block
            m_p = m_prev[:, k:k + 1]
            m_new = jnp.maximum(m_p, jnp.max(e, axis=-1, keepdims=True))
            corr = jnp.exp(m_p - m_new)
            # zero masked probabilities explicitly -> isolated rows keep l == 0 (torch
            # sparse.mm gives exact zeros for nodes with no neighbors)
            p = jnp.where(nbr_mask, jnp.exp(e - m_new), 0.0)

            l_cols.append(corr * l_prev[:, k:k + 1]
                          + jnp.sum(p, axis=-1, keepdims=True))
            pv = jnp.dot(p.astype(h.dtype), h[:, sl],
                         preferred_element_type=jnp.float32)        # (tile_n, D_out)
            acc_cols.append(corr * acc_prev[:, sl] + pv)
            m_cols.append(m_new)

        # one packed, lane-dense store per state tensor per grid step
        m_sc[...] = jnp.concatenate(m_cols, axis=-1)
        l_sc[...] = jnp.concatenate(l_cols, axis=-1)
        acc_sc[...] = jnp.concatenate(acc_cols, axis=-1)

    @pl.when(jj == nj - 1)
    def _finalize():
        l = l_sc[...]
        safe_l = jnp.where(l > 0.0, l, 1.0)
        inv_l = pl.reciprocal(safe_l, approx=True)      # EUP slot
        inv_l = inv_l * (2.0 - safe_l * inv_l)          # one Newton step -> ~f32 accuracy
        inv_l = jnp.where(l > 0.0, inv_l, 0.0)          # isolated / padded rows -> zeros
        acc = acc_sc[...]
        outs = [acc[:, k * d_out:(k + 1) * d_out] * inv_l[:, k:k + 1]
                for k in range(num_heads)]
        out_ref[...] = jnp.concatenate(outs, axis=-1).astype(out_ref.dtype)


# ---------------------------------------------------------------------------
# Wrapper
# ---------------------------------------------------------------------------
def graph_attention_pallas(features, W, b, a_self, a_nbr, a_bias, mask, mapped_idx,
                           *, tile_n=None, tile_np=None, matmul_dtype=None):
    """Multi-head GAT forward.

    features   : (n', D_in) f32
    W          : (H, D_in, D_out)  per-head fc weight ((in, out) layout vs torch)
    b          : (H, D_out)
    a_self     : (H, D_out)        first half of torch `a.weight` (self features)
    a_nbr      : (H, D_out)        second half of torch `a.weight` (neighbor features)
    a_bias     : (H,)
    mask       : (N, n') {0,1}     mask[i, j] = 1 iff j is a mapped neighbor of nodes[i]
    mapped_idx : (N,) int32        mapping[nodes[i]] (row of `features` holding node i)

    Returns (H, N, D_out) f32; entry k mirrors the k-th tensor of the torch output list.
    """
    H, D_in, D_out = W.shape
    N, n_prime = mask.shape
    HD = H * D_out
    f32 = jnp.float32
    mm_dtype = jnp.dtype(matmul_dtype) if matmul_dtype is not None else jnp.dtype(f32)
    mm_bytes = mm_dtype.itemsize

    # ---- tile sizes (last two block dims must be (8,128)-aligned or full extents) ----
    # NOTE(v7x): for large N prefer tile_n <= n_pad/2 so grid[0] >= 2 and both
    # TensorCores get work; the demo problem (N=24) collapses to a single block.
    if tile_n is None:
        tile_n = min(256, _round_up(N, 32))
    if tile_n >= N:
        tile_n = _round_up(N, 32)               # 32-multiple keeps the int8 mask tile legal
        n_pad = tile_n
    else:
        tile_n = _round_up(tile_n, 32)
        n_pad = _round_up(N, tile_n)
    if tile_np is None:
        tile_np = 512                            # fewer, fatter steps amortize overhead
    if tile_np >= n_prime:
        tile_np = _round_up(n_prime, 8)
        np_pad = tile_np
    else:
        tile_np = _round_up(tile_np, 128)
        np_pad = _round_up(n_prime, tile_np)
    grid_i = n_pad // tile_n
    grid_j_full = np_pad // tile_np

    # ---- host-side block-sparsity schedule: which n'-tiles are active per N-tile ----
    mask_host = np.asarray(mask) != 0
    mask_pad_np = np.zeros((n_pad, np_pad), dtype=bool)
    mask_pad_np[:N, :n_prime] = mask_host
    act = mask_pad_np.reshape(grid_i, tile_n, grid_j_full, tile_np).any(axis=(1, 3))
    counts = act.sum(axis=1).astype(np.int32)                       # (grid_i,)
    max_active = max(1, int(counts.max()))
    tmap = np.zeros((grid_i, max_active), dtype=np.int32)
    for ii in range(grid_i):
        nz = np.nonzero(act[ii])[0]
        tmap[ii, :nz.size] = nz                                      # padding -> tile 0 (skipped)

    # ---- pack / fold parameters on the host ----
    Wf = jnp.asarray(W, f32)
    a_self_f = jnp.asarray(a_self, f32)
    a_nbr_f = jnp.asarray(a_nbr, f32)
    bf = jnp.asarray(b, f32)

    w_all = jnp.transpose(Wf, (1, 0, 2)).reshape(D_in, HD)           # heads packed on lanes
    wa_self = jnp.einsum("hid,hd->ih", Wf, a_self_f)                 # (D_in, H)
    wa_nbr = jnp.einsum("hid,hd->ih", Wf, a_nbr_f)                   # (D_in, H)
    w_ext = jnp.concatenate([w_all, wa_self, wa_nbr], axis=1).astype(mm_dtype)

    b_all = bf.reshape(1, HD)
    b_self = jnp.sum(bf * a_self_f, axis=-1).reshape(1, H)
    b_nbr = jnp.sum(bf * a_nbr_f, axis=-1).reshape(1, H)
    b_ext = jnp.concatenate([b_all, b_self, b_nbr], axis=1)          # (1, HD+2H) f32

    feat = jnp.asarray(features, f32)
    feat_p = jnp.zeros((np_pad, D_in), f32).at[:n_prime].set(feat).astype(mm_dtype)

    mask_p = jnp.asarray(mask_pad_np.astype(np.int8))                # int8 adjacency

    # ---- stage 1: projection GEMM (one pass over n'; no redundant recompute later) ----
    proj_cost = pl.CostEstimate(
        flops=int(2 * np_pad * D_in * (HD + 2 * H)),
        transcendentals=0,
        bytes_accessed=int(np_pad * D_in * mm_bytes + D_in * (HD + 2 * H) * mm_bytes
                           + np_pad * (HD * mm_bytes + 2 * H * 4)))
    h_all, sc_all = pl.pallas_call(
        functools.partial(_proj_kernel, hd=HD),
        out_shape=(jax.ShapeDtypeStruct((np_pad, HD), mm_dtype),
                   jax.ShapeDtypeStruct((np_pad, 2 * H), f32)),
        grid=(grid_j_full,),
        in_specs=[
            pl.BlockSpec((tile_np, D_in), lambda j: (j, 0)),
            pl.BlockSpec((D_in, HD + 2 * H), lambda j: (0, 0)),
            pl.BlockSpec((1, HD + 2 * H), lambda j: (0, 0)),
        ],
        out_specs=(pl.BlockSpec((tile_np, HD), lambda j: (j, 0)),
                   pl.BlockSpec((tile_np, 2 * H), lambda j: (j, 0))),
        compiler_params=pltpu.CompilerParams(dimension_semantics=("parallel",)),
        cost_estimate=proj_cost,
    )(feat_p, w_ext, b_ext)

    # self scores gathered once for the target nodes (O(N*H)); a_bias folded in.
    idx_pad = jnp.zeros((n_pad,), jnp.int32).at[:N].set(jnp.asarray(mapped_idx, jnp.int32))
    s_self = jnp.take(sc_all[:, :H], idx_pad, axis=0) + jnp.asarray(a_bias, f32)[None, :]
    # neighbor scores streamed pre-transposed -> no in-kernel XLU transposes.
    s_nbr_t = jnp.transpose(sc_all[:, H:])                           # (H, np_pad) f32

    # ---- scheduling hints ----
    total_active = int(counts.sum())
    flops = int(total_active * (2 * H * tile_n * tile_np * D_out + 12 * H * tile_n * tile_np)
                + grid_i * 6 * tile_n * HD)
    transcend = int(total_active * H * tile_n * (tile_np + 1) + grid_i * tile_n * H)
    bytes_accessed = int(total_active * (tile_np * HD * mm_bytes + H * tile_np * 4
                                         + tile_n * tile_np)
                         + grid_i * (tile_n * H * 4 + 2 * tile_n * HD * 4))
    hd_lanes = _round_up(HD, 128)
    vmem_est = (2 * (tile_np * hd_lanes * mm_bytes      # h block (double buffered)
                     + 8 * tile_np * 4                  # s_nbr_T block
                     + tile_n * 128 * 4                 # s_self block (lane padded)
                     + tile_n * tile_np)                # int8 mask block
                + 2 * tile_n * hd_lanes * 4             # out block
                + 3 * tile_n * 128 * 4                  # m/l/acc scratch (lane padded)
                + 6 * tile_n * tile_np * 4)             # e/p temporaries headroom
    # cap well below v7x's 64 MiB/TC physical VMEM
    vmem_limit = int(min(48 * 2 ** 20, max(32 * 2 ** 20, 2 * vmem_est)))

    kernel = functools.partial(_gat_attn_kernel, num_heads=H, d_out=D_out)

    out_p = pl.pallas_call(
        kernel,
        out_shape=jax.ShapeDtypeStruct((n_pad, HD), f32),
        grid_spec=pltpu.PrefetchScalarGridSpec(
            num_scalar_prefetch=2,
            grid=(grid_i, max_active),
            in_specs=[
                # packed neighbor projections, gathered tile by active-tile map
                pl.BlockSpec((tile_np, HD), lambda i, jj, tmap, cnt: (tmap[i, jj], 0)),
                # pre-transposed neighbor scores
                pl.BlockSpec((H, tile_np), lambda i, jj, tmap, cnt: (0, tmap[i, jj])),
                # self scores (per N tile, constant over jj)
                pl.BlockSpec((tile_n, H), lambda i, jj, tmap, cnt: (i, 0)),
                # int8 adjacency mask tile
                pl.BlockSpec((tile_n, tile_np), lambda i, jj, tmap, cnt: (i, tmap[i, jj])),
            ],
            out_specs=pl.BlockSpec((tile_n, HD), lambda i, jj, tmap, cnt: (i, 0)),
            scratch_shapes=[
                pltpu.VMEM((tile_n, H), f32),     # m (lane-dense packed)
                pltpu.VMEM((tile_n, H), f32),     # l
                pltpu.VMEM((tile_n, HD), f32),    # acc
            ]),
        compiler_params=pltpu.CompilerParams(
            dimension_semantics=("parallel", "arbitrary"),
            vmem_limit_bytes=vmem_limit),
        cost_estimate=pl.CostEstimate(flops=flops, transcendentals=transcend,
                                      bytes_accessed=bytes_accessed),
    )(jnp.asarray(tmap), jnp.asarray(counts), h_all, s_nbr_t, s_self, mask_p)

    out = out_p[:N]                                                   # drop N padding
    return jnp.transpose(out.reshape(N, H, D_out), (1, 0, 2))         # (H, N, D_out)


def reference_jax(features, W, b, a_self, a_nbr, a_bias, mask, mapped_idx):
    """Plain-JAX mirror of the dense formulation (correctness check)."""
    outs = []
    for k in range(W.shape[0]):
        h = features @ W[k] + b[k]
        s_self = h[mapped_idx] @ a_self[k]
        s_nbr = h @ a_nbr[k]
        e = s_self[:, None] + s_nbr[None, :] + a_bias[k]
        e = jnp.where(e >= 0, e, LEAKY_SLOPE * e)
        e = jnp.where(mask > 0, e, NEG_INF)
        alpha = jax.nn.softmax(e, axis=-1)
        outs.append(alpha @ h)
    return jnp.stack(outs)


if __name__ == "__main__":
    # ---- sizes ----
    input_dim, output_dim, num_heads = 8, 16, 2
    n_prime = 160          # nodes in the previous computation-graph layer
    num_nodes = 24         # len(nodes) in the current layer

    # ---- deterministic graph structure (nodes / mapping / rows) + dense encoding ----
    mapping = {v: v for v in range(n_prime)}                # identity mapping for the demo
    nodes = np.arange(0, 2 * num_nodes, 2)                  # node ids in the current layer
    rows = [np.array([(11 * i + 37 * t + 3) % n_prime for t in range(2 + (i % 5))])
            for i in range(num_nodes)]                      # neighbors spread over n'

    mapped_idx = np.array([mapping[int(v)] for v in nodes], dtype=np.int32)
    mask_np = np.zeros((num_nodes, n_prime), dtype=np.int8)
    for i, row in enumerate(rows):
        for c in row:
            mask_np[i, mapping[int(c)]] = 1
    mask = jnp.asarray(mask_np)
    mapped_idx_j = jnp.asarray(mapped_idx)

    # ---- deterministic parameters (nn.Linear-style U(-1/sqrt(fan_in), 1/sqrt(fan_in))) ----
    key = jax.random.PRNGKey(0)
    kf, kw, kb, kaw, kab = jax.random.split(key, 5)
    features = jax.random.normal(kf, (n_prime, input_dim), dtype=jnp.float32)
    lim_fc = 1.0 / np.sqrt(input_dim)
    W = jax.random.uniform(kw, (num_heads, input_dim, output_dim),
                           minval=-lim_fc, maxval=lim_fc, dtype=jnp.float32)
    b = jax.random.uniform(kb, (num_heads, output_dim),
                           minval=-lim_fc, maxval=lim_fc, dtype=jnp.float32)
    lim_a = 1.0 / np.sqrt(2 * output_dim)
    a_w = jax.random.uniform(kaw, (num_heads, 2 * output_dim),
                             minval=-lim_a, maxval=lim_a, dtype=jnp.float32)
    a_self, a_nbr = a_w[:, :output_dim], a_w[:, output_dim:]
    a_bias = jax.random.uniform(kab, (num_heads,), minval=-lim_a, maxval=lim_a,
                                dtype=jnp.float32)

    ref = jax.block_until_ready(
        reference_jax(features, W, b, a_self, a_nbr, a_bias,
                      mask.astype(jnp.float32), mapped_idx_j))

    # (a) default tiling: the whole problem fits a single (N, n') block
    out_a = jax.block_until_ready(
        graph_attention_pallas(features, W, b, a_self, a_nbr, a_bias, mask, mapped_idx_j))
    np.testing.assert_allclose(np.asarray(out_a), np.asarray(ref), rtol=1e-4, atol=1e-5)

    # (b) forced n'-tiling: exercises block-sparse tile selection + online-softmax accum
    out_b = jax.block_until_ready(
        graph_attention_pallas(features, W, b, a_self, a_nbr, a_bias, mask, mapped_idx_j,
                               tile_np=128))
    np.testing.assert_allclose(np.asarray(out_b), np.asarray(ref), rtol=1e-4, atol=1e-5)

    # (c) bf16 MXU operands cast once in HBM (f32 softmax / accumulation), for v6e/v7x
    out_c = jax.block_until_ready(
        graph_attention_pallas(features, W, b, a_self, a_nbr, a_bias, mask, mapped_idx_j,
                               tile_np=128, matmul_dtype=jnp.bfloat16))
    np.testing.assert_allclose(np.asarray(out_c), np.asarray(ref), rtol=3e-2, atol=3e-2)

    # out_a[k] is the per-head (len(nodes) x output_dim) result, mirroring the torch list output
    _ = [out_a[k] for k in range(num_heads)]

    print("KERNEL_OK")
</pallas_src>

<mosaic_0001>
module attributes {stable_mosaic.version = 11 : i64} {
  func.func @_proj_kernel(%arg0: i32, %arg1: memref<160x8xf32, #tpu.memory_space<vmem>>, %arg2: memref<8x36xf32, #tpu.memory_space<vmem>>, %arg3: memref<1x36xf32, #tpu.memory_space<vmem>>, %arg4: memref<160x32xf32, #tpu.memory_space<vmem>>, %arg5: memref<160x4xf32, #tpu.memory_space<vmem>>) attributes {dimension_semantics = [#tpu.dimension_semantics<parallel>], iteration_bounds = array<i64: 1>, scalar_prefetch = 0 : i64, scratch_operands = 0 : i64, tpu.core_type = #tpu.core_type<tc>, window_params = [{transform_indices = @transform_0, window_bounds = array<i64: 160, 8>}, {pipeline_mode = #tpu.pipeline_mode<synchronous>, transform_indices = @transform_1, window_bounds = array<i64: 8, 36>}, {pipeline_mode = #tpu.pipeline_mode<synchronous>, transform_indices = @transform_2, window_bounds = array<i64: 1, 36>}, {transform_indices = @transform_3, window_bounds = array<i64: 160, 32>}, {transform_indices = @transform_4, window_bounds = array<i64: 160, 4>}]} {
    %c0 = arith.constant 0 : index
    %c0_0 = arith.constant 0 : index
    %0 = vector.load %arg1[%c0, %c0_0] : memref<160x8xf32, #tpu.memory_space<vmem>>, vector<160x8xf32>
    %c0_1 = arith.constant 0 : index
    %c0_2 = arith.constant 0 : index
    %1 = vector.load %arg2[%c0_1, %c0_2] : memref<8x36xf32, #tpu.memory_space<vmem>>, vector<8x36xf32>
    %cst = arith.constant dense<0.000000e+00> : vector<160x36xf32>
    %2 = tpu.matmul %0, %1, %cst {dimension_numbers = #tpu.dot_dimension_numbers<[1], [0], [0], [1], [0, 0, 1, 1], [], []>} : vector<160x8xf32>, vector<8x36xf32>, vector<160x36xf32> -> vector<160x36xf32>
    %c0_3 = arith.constant 0 : index
    %c0_4 = arith.constant 0 : index
    %3 = vector.load %arg3[%c0_3, %c0_4] : memref<1x36xf32, #tpu.memory_space<vmem>>, vector<1x36xf32>
    %4 = vector.broadcast %3 : vector<1x36xf32> to vector<160x36xf32>
    %5 = arith.addf %2, %4 : vector<160x36xf32>
    %6 = vector.extract_strided_slice %5 {offsets = [0, 0], sizes = [160, 32], strides = [1, 1]} : vector<160x36xf32> to vector<160x32xf32>
    %c0_5 = arith.constant 0 : index
    %c0_6 = arith.constant 0 : index
    %7 = vector.load %arg4[%c0_5, %c0_6] : memref<160x32xf32, #tpu.memory_space<vmem>>, vector<160x32xf32>
    tpu.vector_store %arg4[%c0_5, %c0_6], %6 {strides = array<i32>} : memref<160x32xf32, #tpu.memory_space<vmem>>, vector<160x32xf32>,
    %8 = vector.extract_strided_slice %5 {offsets = [0, 32], sizes = [160, 4], strides = [1, 1]} : vector<160x36xf32> to vector<160x4xf32>
    %c0_7 = arith.constant 0 : index
    %c0_8 = arith.constant 0 : index
    %9 = vector.load %arg5[%c0_7, %c0_8] : memref<160x4xf32, #tpu.memory_space<vmem>>, vector<160x4xf32>
    tpu.vector_store %arg5[%c0_7, %c0_8], %8 {strides = array<i32>} : memref<160x4xf32, #tpu.memory_space<vmem>>, vector<160x4xf32>,
    return
  }
  func.func @transform_0(%arg0: i32) -> (i32, i32) {
    %c0_i32 = arith.constant 0 : i32
    %c0_i32_0 = arith.constant 0 : i32
    return %arg0, %c0_i32 : i32, i32
  }
  func.func @transform_1(%arg0: i32) -> (i32, i32) {
    %c0_i32 = arith.constant 0 : i32
    %c0_i32_0 = arith.constant 0 : i32
    %c0_i32_1 = arith.constant 0 : i32
    return %c0_i32, %c0_i32_0 : i32, i32
  }
  func.func @transform_2(%arg0: i32) -> (i32, i32) {
    %c0_i32 = arith.constant 0 : i32
    %c0_i32_0 = arith.constant 0 : i32
    %c0_i32_1 = arith.constant 0 : i32
    return %c0_i32, %c0_i32_0 : i32, i32
  }
  func.func @transform_3(%arg0: i32) -> (i32, i32) {
    %c0_i32 = arith.constant 0 : i32
    %c0_i32_0 = arith.constant 0 : i32
    return %arg0, %c0_i32 : i32, i32
  }
  func.func @transform_4(%arg0: i32) -> (i32, i32) {
    %c0_i32 = arith.constant 0 : i32
    %c0_i32_0 = arith.constant 0 : i32
    return %arg0, %c0_i32 : i32, i32
  }
}

</mosaic_0001>

<bundles_post_ra>
// kernel: tpu_custom_call.1
= control target key start
LH: loop header
LB: loop body
LE: loop exit
PB: predicated region body
PF: predicated region fallthrough
CT: control target
= control target key end

     0   :  { %vm41_vm0 = vcmask 64512   ;;  %vm179_vm1 = vcmask 261120   ;;  %s334_s6 = smov 96   ;;  %vm280_vm2 = vcmask 31744   ;;  %s648_s1 = inlined_call_operand.vmem [shape: f32[8,36], index: 1, kind: input, shape index: {}]   ;;  %s649_s0 = inlined_call_operand.vmem [shape: f32[160,8], index: 0, kind: input, shape index: {}]   ;;  %s650_s2 = inlined_call_operand.vmem [shape: f32[1,36], index: 2, kind: input, shape index: {}]   ;;  %s651_s3 = inlined_call_operand.vmem [shape: f32[160,32], index: 3, kind: output, shape index: {0}]   ;;  %s652_s4 = inlined_call_operand.vmem [shape: f32[160,4], index: 4, kind: output, shape index: {1}]  }
   0x1   :  { %v36_v0 = vld [vmem:[%s648_s1] sm:$0xff]  ;;  %v21_v2 = vld [vmem:[%s649_s0 + $0x28] sm:$0xff]  ;;  %v26_v3 = vld [vmem:[%s649_s0 + $0x50] sm:$0xff] }
   0x2   :  { %v16_v1 = vld [vmem:[%s649_s0] sm:$0xff]  ;;  %117 = vmatpush.msra.mxu0 %v36_v0  ;;  %329 = vmatpush.msra.mxu1 %v36_v0  ;;  %v31_v4 = vld [vmem:[%s649_s0 + $0x78] sm:$0xff]  ;;  %v17_v5 = vld [vmem:[%s649_s0 + $0x8] sm:$0xff] }
   0x3   :  { %330 = vmatpush.msra.mxu2 %v36_v0  ;;  %331 = vmatpush.msra.mxu3 %v36_v0  ;;  %v22_v6 = vld [vmem:[%s649_s0 + $0x30] sm:$0xff]  ;;  %v32_v7 = vld [vmem:[%s649_s0 + $0x80] sm:$0xff]  ;;  %v27_v8 = vld [vmem:[%s649_s0 + $0x58] sm:$0xff] }
   0x4   :  { %309 = vmatmul.msk.f32.vlgmr.msra.gmra.mxu0 %vm41_vm0, %v16_v1  ;;  %314 = vmatmul.msk.f32.vlgmr.msra.gmra.mxu1 %vm41_vm0, %v21_v2  ;;  %v18_v9 = vld [vmem:[%s649_s0 + $0x10] sm:$0xff]  ;;  %v23_v10 = vld [vmem:[%s649_s0 + $0x38] sm:$0xff]  ;;  %v28_v11 = vld [vmem:[%s649_s0 + $0x60] sm:$0xff] }
   0x5   :  { %319 = vmatmul.msk.f32.vlgmr.msra.gmra.mxu2 %vm41_vm0, %v26_v3  ;;  %324 = vmatmul.msk.f32.vlgmr.msra.gmra.mxu3 %vm41_vm0, %v31_v4  ;;  %v33_v12 = vld [vmem:[%s649_s0 + $0x88] sm:$0xff]  ;;  %v19_v13 = vld [vmem:[%s649_s0 + $0x18] sm:$0xff]  ;;  %v24_v14 = vld [vmem:[%s649_s0 + $0x40] sm:$0xff] }
   0x6   :  { %v29_v15 = vld [vmem:[%s649_s0 + $0x68] sm:$0xff]  ;;  %v34_v16 = vld [vmem:[%s649_s0 + $0x90] sm:$0xff]  ;;  %v20_v17 = vld [vmem:[%s649_s0 + $0x20] sm:$0xff] }
   0x7   :  { %v25_v18 = vld [vmem:[%s649_s0 + $0x48] sm:$0xff]  ;;  %v30_v19 = vld [vmem:[%s649_s0 + $0x70] sm:$0xff]  ;;  %v35_v20 = vld [vmem:[%s649_s0 + $0x98] sm:$0xff] }
   0x8   :  { %v446_v21 = vld [vmem:[%s650_s2] ss:$0 sm:$0xff] }
   0xc   :  { %310 = vmatmul.msk.f32.gmra.mxu0 %vm41_vm0, %v17_v5  ;;  %315 = vmatmul.msk.f32.gmra.mxu1 %vm41_vm0, %v22_v6 }
   0xd   :  { %325 = vmatmul.msk.f32.gmra.mxu3 %vm41_vm0, %v32_v7  ;;  %320 = vmatmul.msk.f32.gmra.mxu2 %vm41_vm0, %v27_v8 }
  0x14   :  { %311 = vmatmul.msk.f32.gmra.mxu0 %vm41_vm0, %v18_v9  ;;  %316 = vmatmul.msk.f32.gmra.mxu1 %vm41_vm0, %v23_v10 }
  0x15   :  { %321 = vmatmul.msk.f32.gmra.mxu2 %vm41_vm0, %v28_v11  ;;  %326 = vmatmul.msk.f32.gmra.mxu3 %vm41_vm0, %v33_v12 }
  0x1c   :  { %312 = vmatmul.msk.f32.gmra.mxu0 %vm41_vm0, %v19_v13  ;;  %317 = vmatmul.msk.f32.gmra.mxu1 %vm41_vm0, %v24_v14 }
  0x1d   :  { %322 = vmatmul.msk.f32.gmra.mxu2 %vm41_vm0, %v29_v15  ;;  %327 = vmatmul.msk.f32.gmra.mxu3 %vm41_vm0, %v34_v16 }
  0x24   :  { %313 = vmatmul.msk.f32.gmra.mxu0 %vm41_vm0, %v20_v17  ;;  %318 = vmatmul.msk.f32.gmra.mxu1 %vm41_vm0, %v25_v18 }
  0x25   :  { %323 = vmatmul.msk.f32.gmra.mxu2 %vm41_vm0, %v30_v19  ;;  %328 = vmatmul.msk.f32.gmra.mxu3 %vm41_vm0, %v35_v20 }
  0x81   :  { %v119_v22 = vpop.f32.mrf.mxu0  ;;  %v134_v23 = vpop.f32.mrf.mxu1 }
  0x82   :  { %v120_v24 = vadd.f32 %v446_v21, %v119_v22  ;;  %v135_v25 = vadd.f32 %v446_v21, %v134_v23 }
  0x84   :  { %180 = vst.msk [vmem:[%s651_s3] sm:$0xff] %vm179_vm1, %v120_v24  ;;  %220 = vrot.lane.b32.xlu0 %v120_v24, %s334_s6  ;;  %230 = vrot.lane.b32.xlu2 %v135_v25, %s334_s6 }
  0x85   :  { %185 = vst.msk [vmem:[%s651_s3 + $0x28] sm:$0xff] %vm179_vm1, %v135_v25 }
  0x88   :  { %v149_v26 = vpop.f32.mrf.mxu2  ;;  %v164_v27 = vpop.f32.mrf.mxu3 }
  0x89   :  { %v150_v28 = vadd.f32 %v446_v21, %v149_v26  ;;  %v165_v29 = vadd.f32 %v446_v21, %v164_v27  ;;  %v122_v30 = vpop.f32.mrf.mxu0  ;;  %v137_v31 = vpop.f32.mrf.mxu1 }
  0x8a   :  { %v123_v32 = vadd.f32 %v446_v21, %v122_v30  ;;  %v138_v33 = vadd.f32 %v446_v21, %v137_v31 }
  0x8b   :  { %190 = vst.msk [vmem:[%s651_s3 + $0x50] sm:$0xff] %vm179_vm1, %v150_v28  ;;  %240 = vrot.lane.b32.xlu1 %v150_v28, %s334_s6 }
  0x8c   :  { %195 = vst.msk [vmem:[%s651_s3 + $0x78] sm:$0xff] %vm179_vm1, %v165_v29  ;;  %250 = vrot.lane.b32.xlu0 %v165_v29, %s334_s6 }
  0x8d   :  { %181 = vst.msk [vmem:[%s651_s3 + $0x8] sm:$0xff] %vm179_vm1, %v123_v32 }
  0x8e   :  { %186 = vst.msk [vmem:[%s651_s3 + $0x30] sm:$0xff] %vm179_vm1, %v138_v33 }
  0x90   :  { %v167_v34 = vpop.f32.mrf.mxu3  ;;  %v152_v35 = vpop.f32.mrf.mxu2 }
  0x91   :  { %v168_v36 = vadd.f32 %v446_v21, %v167_v34  ;;  %v125_v37 = vpop.f32.mrf.mxu0  ;;  %v140_v38 = vpop.f32.mrf.mxu1  ;;  %v153_v39 = vadd.f32 %v446_v21, %v152_v35 }
  0x92   :  { %v126_v40 = vadd.f32 %v446_v21, %v125_v37  ;;  %v141_v41 = vadd.f32 %v446_v21, %v140_v38 }
  0x93   :  { %196 = vst.msk [vmem:[%s651_s3 + $0x80] sm:$0xff] %vm179_vm1, %v168_v36  ;;  %252 = vrot.lane.b32.xlu1 %v168_v36, %s334_s6  ;;  %242 = vrot.lane.b32.xlu2 %v153_v39, %s334_s6 }
  0x94   :  { %182 = vst.msk [vmem:[%s651_s3 + $0x10] sm:$0xff] %vm179_vm1, %v126_v40  ;;  %222 = vrot.lane.b32.xlu0 %v123_v32, %s334_s6 }
  0x95   :  { %187 = vst.msk [vmem:[%s651_s3 + $0x38] sm:$0xff] %vm179_vm1, %v141_v41 }
  0x96   :  { %191 = vst.msk [vmem:[%s651_s3 + $0x58] sm:$0xff] %vm179_vm1, %v153_v39 }
  0x98   :  { %v155_v42 = vpop.f32.mrf.mxu2  ;;  %v170_v43 = vpop.f32.mrf.mxu3 }
  0x99   :  { %v128_v44 = vpop.f32.mrf.mxu0  ;;  %v143_v45 = vpop.f32.mrf.mxu1  ;;  %v156_v46 = vadd.f32 %v446_v21, %v155_v42  ;;  %v171_v49 = vadd.f32 %v446_v21, %v170_v43 }
  0x9a   :  { %v129_v47 = vadd.f32 %v446_v21, %v128_v44  ;;  %v144_v48 = vadd.f32 %v446_v21, %v143_v45 }
  0x9b   :  { %192 = vst.msk [vmem:[%s651_s3 + $0x60] sm:$0xff] %vm179_vm1, %v156_v46  ;;  %224 = vrot.lane.b32.xlu1 %v126_v40, %s334_s6 }
  0x9c   :  { %183 = vst.msk [vmem:[%s651_s3 + $0x18] sm:$0xff] %vm179_vm1, %v129_v47  ;;  %236 = vrot.lane.b32.xlu2 %v144_v48, %s334_s6  ;;  %232 = vrot.lane.b32.xlu0 %v138_v33, %s334_s6 }
  0x9d   :  { %188 = vst.msk [vmem:[%s651_s3 + $0x40] sm:$0xff] %vm179_vm1, %v144_v48 }
  0x9e   :  { %197 = vst.msk [vmem:[%s651_s3 + $0x88] sm:$0xff] %vm179_vm1, %v171_v49 }
  0xa0   :  { %v158_v50 = vpop.f32.mrf.mxu2  ;;  %v173_v51 = vpop.f32.mrf.mxu3 }
  0xa1   :  { %v131_v52 = vpop.f32.mrf.mxu0  ;;  %v159_v53 = vadd.f32 %v446_v21, %v158_v50  ;;  %v146_v54 = vpop.f32.mrf.mxu1  ;;  %v174_v56 = vadd.f32 %v446_v21, %v173_v51 }
  0xa2   :  { %v132_v55 = vadd.f32 %v446_v21, %v131_v52  ;;  %v147_v57 = vadd.f32 %v446_v21, %v146_v54 }
  0xa3   :  { %193 = vst.msk [vmem:[%s651_s3 + $0x68] sm:$0xff] %vm179_vm1, %v159_v53  ;;  %234 = vrot.lane.b32.xlu1 %v141_v41, %s334_s6 }
  0xa4   :  { %184 = vst.msk [vmem:[%s651_s3 + $0x20] sm:$0xff] %vm179_vm1, %v132_v55  ;;  %228 = vrot.lane.b32.xlu2 %v132_v55, %s334_s6  ;;  %244 = vrot.lane.b32.xlu0 %v156_v46, %s334_s6 }
  0xa5   :  { %189 = vst.msk [vmem:[%s651_s3 + $0x48] sm:$0xff] %vm179_vm1, %v147_v57 }
  0xa6   :  { %198 = vst.msk [vmem:[%s651_s3 + $0x90] sm:$0xff] %vm179_vm1, %v174_v56 }
  0xa8   :  { %v161_v58 = vpop.f32.mrf.mxu2  ;;  %v176_v59 = vpop.f32.mrf.mxu3 }
  0xa9   :  { %v162_v60 = vadd.f32 %v446_v21, %v161_v58  ;;  %v177_v61 = vadd.f32 %v446_v21, %v176_v59 }
  0xab   :  { %194 = vst.msk [vmem:[%s651_s3 + $0x70] sm:$0xff] %vm179_vm1, %v162_v60  ;;  %226 = vrot.lane.b32.xlu1 %v129_v47, %s334_s6 }
  0xac   :  { %248 = vrot.lane.b32.xlu2 %v162_v60, %s334_s6  ;;  %238 = vrot.lane.b32.xlu0 %v147_v57, %s334_s6  ;;  %199 = vst.msk [vmem:[%s651_s3 + $0x98] sm:$0xff] %vm179_vm1, %v177_v61 }
  0xb3   :  { %246 = vrot.lane.b32.xlu1 %v159_v53, %s334_s6 }
  0xb4   :  { %254 = vrot.lane.b32.xlu2 %v171_v49, %s334_s6  ;;  %256 = vrot.lane.b32.xlu0 %v174_v56, %s334_s6 }
  0xbb   :  { %258 = vrot.lane.b32.xlu1 %v177_v61, %s334_s6 }
  0xde   :  { %v231_v62 = vpop.permute.xlu2 %230 }
  0xdf   :  { %286 = vst.msk [vmem:[%s652_s4 + $0x28] sm:$0xff] %vm280_vm2, %v231_v62 }
  0xed   :  { %v243_v63 = vpop.permute.xlu2 %242 }
  0xee   :  { %292 = vst.msk [vmem:[%s652_s4 + $0x58] sm:$0xff] %vm280_vm2, %v243_v63 }
  0xf6   :  { %v237_v0 = vpop.permute.xlu2 %236  ;;  %v221_v1 = vpop.permute.xlu0 %220 }
  0xf7   :  { %289 = vst.msk [vmem:[%s652_s4 + $0x40] sm:$0xff] %vm280_vm2, %v237_v0 }
  0xf8   :  { %281 = vst.msk [vmem:[%s652_s4] sm:$0xff] %vm280_vm2, %v221_v1 }
  0xfd   :  { %v241_v2 = vpop.permute.xlu1 %240 }
  0xfe   :  { %291 = vst.msk [vmem:[%s652_s4 + $0x50] sm:$0xff] %vm280_vm2, %v241_v2  ;;  %v229_v3 = vpop.permute.xlu2 %228  ;;  %v251_v4 = vpop.permute.xlu0 %250 }
  0xff   :  { %285 = vst.msk [vmem:[%s652_s4 + $0x20] sm:$0xff] %vm280_vm2, %v229_v3 }
 0x100   :  { %296 = vst.msk [vmem:[%s652_s4 + $0x78] sm:$0xff] %vm280_vm2, %v251_v4 }
 0x105   :  { %v253_v5 = vpop.permute.xlu1 %252 }
 0x106   :  { %297 = vst.msk [vmem:[%s652_s4 + $0x80] sm:$0xff] %vm280_vm2, %v253_v5  ;;  %v249_v6 = vpop.permute.xlu2 %248  ;;  %v223_v7 = vpop.permute.xlu0 %222 }
 0x107   :  { %295 = vst.msk [vmem:[%s652_s4 + $0x70] sm:$0xff] %vm280_vm2, %v249_v6 }
 0x108   :  { %282 = vst.msk [vmem:[%s652_s4 + $0x8] sm:$0xff] %vm280_vm2, %v223_v7 }
 0x10d   :  { %v225_v8 = vpop.permute.xlu1 %224 }
 0x10e   :  { %283 = vst.msk [vmem:[%s652_s4 + $0x10] sm:$0xff] %vm280_vm2, %v225_v8  ;;  %v255_v9 = vpop.permute.xlu2 %254  ;;  %v233_v10 = vpop.permute.xlu0 %232 }
 0x10f   :  { %298 = vst.msk [vmem:[%s652_s4 + $0x88] sm:$0xff] %vm280_vm2, %v255_v9 }
 0x110   :  { %287 = vst.msk [vmem:[%s652_s4 + $0x30] sm:$0xff] %vm280_vm2, %v233_v10 }
 0x115   :  { %v235_v11 = vpop.permute.xlu1 %234 }
 0x116   :  { %288 = vst.msk [vmem:[%s652_s4 + $0x38] sm:$0xff] %vm280_vm2, %v235_v11  ;;  %v245_v12 = vpop.permute.xlu0 %244 }
 0x117   :  { %293 = vst.msk [vmem:[%s652_s4 + $0x60] sm:$0xff] %vm280_vm2, %v245_v12 }
 0x11d   :  { %v227_v13 = vpop.permute.xlu1 %226 }
 0x11e   :  { %284 = vst.msk [vmem:[%s652_s4 + $0x18] sm:$0xff] %vm280_vm2, %v227_v13  ;;  %v239_v14 = vpop.permute.xlu0 %238 }
 0x11f   :  { %290 = vst.msk [vmem:[%s652_s4 + $0x48] sm:$0xff] %vm280_vm2, %v239_v14 }
 0x125   :  { %v247_v15 = vpop.permute.xlu1 %246 }
 0x126   :  { %294 = vst.msk [vmem:[%s652_s4 + $0x68] sm:$0xff] %vm280_vm2, %v247_v15  ;;  %v257_v16 = vpop.permute.xlu0 %256 }
 0x127   :  { %299 = vst.msk [vmem:[%s652_s4 + $0x90] sm:$0xff] %vm280_vm2, %v257_v16 }
 0x12d   :  { %v259_v17 = vpop.permute.xlu1 %258 }
 0x12e   :  { %300 = vst.msk [vmem:[%s652_s4 + $0x98] sm:$0xff] %vm280_vm2, %v259_v17 }

</bundles_post_ra>
